<compile_context>
chip_gen: v7x
topology: tpu7x:2x2x1
jax: 0.10.0
libtpu: 0.0.40
codegen_flags: <defaults>
</compile_context>

<pallas_src>
import jax
import jax.numpy as jnp
from jax import lax
from jax.experimental import pallas as pl
from jax.experimental.pallas import tpu as pltpu

_NEG_BIG = -1e30  # Python float only; never close over jnp scalars in kernels.


def _round_up(x, m):
    return (x + m - 1) // m * m


# ----------------------------------------------------------------------------
# Row gather: table[idx] -> (tile, v_lanes) f32
# ----------------------------------------------------------------------------
def _gather_rows(idx_col, table, tile, v_rows, use_gather):
    if use_gather:
        # Direct row gather on the VMEM-resident table: O(tile * V) data
        # movement, no MXU involvement.
        return jnp.take(table, idx_col[:, 0], axis=0, mode="promise_in_bounds")
    # Fallback (always lowers): one-hot @ table on the MXU.  Precision pinned
    # to HIGHEST so the f32 table rows are reproduced to ~2^-32 rel. error
    # (a plain bf16 MXU pass would truncate them).
    onehot = (lax.broadcasted_iota(jnp.int32, (tile, v_rows), 1) == idx_col
              ).astype(jnp.float32)
    return jnp.dot(onehot, table, precision=lax.Precision.HIGHEST,
                   preferred_element_type=jnp.float32)


# ----------------------------------------------------------------------------
# Kernels
# ----------------------------------------------------------------------------
def _make_train_kernel(tile, v_lanes, v_rows, bt, use_gather, emit_logits):
    def kernel(idx_ref, tgt_ref, table_ref, *out_refs):
        # idx_ref/tgt_ref: (tile, 1) i32;  table_ref: (v_rows, v_lanes) f32
        # out_refs: ([logits (tile, v_lanes) f32,] loss (tile, 1) f32)
        if emit_logits:
            logits_ref, loss_ref = out_refs
        else:
            (loss_ref,) = out_refs

        idx = idx_ref[...]
        logits = _gather_rows(idx, table_ref[...], tile, v_rows, use_gather)
        if emit_logits:
            logits_ref[...] = logits                 # lane-dense (x128) store

        # Cross entropy (log-softmax + target pick).  Padded vocab lanes
        # already hold -1e30 from the wrapper-side table padding, so no
        # in-kernel lane mask is needed: exp(-1e30 - m) underflows to 0.
        m = jnp.max(logits, axis=-1, keepdims=True)
        lse = m + jnp.log(jnp.sum(jnp.exp(logits - m), axis=-1, keepdims=True))
        col = lax.broadcasted_iota(jnp.int32, (tile, v_lanes), 1)
        tgt_logit = jnp.sum(jnp.where(col == tgt_ref[...], logits, 0.0),
                            axis=-1, keepdims=True)

        # Zero padded BT rows so the wrapper can reduce with a plain sum / BT.
        row = lax.broadcasted_iota(jnp.int32, (tile, 1), 0)
        valid = (pl.program_id(0) * tile + row) < bt
        loss_ref[...] = jnp.where(valid, lse - tgt_logit, 0.0)

    return kernel


def _make_infer_kernel(tile, v_rows, use_gather):
    def kernel(idx_ref, table_ref, logits_ref):
        logits_ref[...] = _gather_rows(idx_ref[...], table_ref[...],
                                       tile, v_rows, use_gather)
    return kernel


# ----------------------------------------------------------------------------
# Tiling / compiler-parameter helpers
# ----------------------------------------------------------------------------
def _choose_tile(bt, desired, v_lanes, emit_logits):
    bt8 = _round_up(max(bt, 1), 8)
    row_bytes = (v_lanes * 4 if emit_logits else 0) + 12   # logits + idx/tgt/loss
    # Keep the double-buffered blocks comfortably inside even v7x's 64 MiB VMEM.
    vmem_cap = max(8, ((24 << 20) // (2 * row_bytes)) // 8 * 8)
    # Aim for >= 8 grid steps so both v7x TensorCores stay fed and the
    # DMA/compute pipeline has depth (v5e/v6e only care about step count).
    step_cap = max(8, _round_up(-(-bt // 8), 8))
    return max(8, min(_round_up(desired, 8), vmem_cap, step_cap, bt8))


def _compiler_params(tile, v_rows, v_lanes, emit_logits):
    table_bytes = v_rows * v_lanes * 4
    row_bytes = (v_lanes * 4 if emit_logits else 0) + 12
    # resident table + double-buffered I/O blocks + in-kernel f32 temporaries
    need = (2 * table_bytes + 2 * tile * row_bytes
            + 3 * tile * v_lanes * 4 + (2 << 20))
    return pltpu.CompilerParams(
        dimension_semantics=("parallel",),
        vmem_limit_bytes=int(min(64 << 20, max(8 << 20, need))))


def _cost(bt_pad, v_lanes, v_rows, train, emit_logits):
    bytes_acc = bt_pad * 4 + v_rows * v_lanes * 4          # idx + table
    flops = 2 * bt_pad * v_lanes
    trans = 0
    if train:
        bytes_acc += bt_pad * 4 + bt_pad * 4               # targets + loss
        flops += 6 * bt_pad * v_lanes
        trans = bt_pad * (v_lanes + 1)                     # exp + log
    if emit_logits:
        bytes_acc += bt_pad * v_lanes * 4                  # dominant store
    return pl.CostEstimate(flops=int(flops), transcendentals=int(trans),
                           bytes_accessed=int(bytes_acc))


# ----------------------------------------------------------------------------
# Gather-support probe: AOT lower + compile (never executes), cached per config
# ----------------------------------------------------------------------------
_GATHER_OK = {}


def _pick_gather(build, arg_structs, key):
    if key not in _GATHER_OK:
        try:
            jax.jit(build(True)).lower(*arg_structs).compile()
            _GATHER_OK[key] = True
        except Exception:   # lowering/compile-time only; nothing has executed
            _GATHER_OK[key] = False
    return _GATHER_OK[key]


# ----------------------------------------------------------------------------
# Forward pass
# ----------------------------------------------------------------------------
def _forward_impl(idx, table, targets, tile_bt, return_logits):
    B, T = idx.shape
    V = table.shape[0]
    BT = B * T

    # TODO(synk): if V ever grows far beyond toy size, lane-tile the vocab
    # (second grid axis + online LSE) so blocks fit v7x's 64 MiB VMEM.
    v_lanes = _round_up(V, 128)          # lane-dense vocab dimension
    v_rows = _round_up(V, 8)             # sublane-aligned table rows

    train = targets is not None
    emit_logits = return_logits or not train

    tile = _choose_tile(BT, tile_bt, v_lanes, emit_logits)
    bt_pad = _round_up(BT, tile)
    n_tiles = bt_pad // tile

    # Pad vocab columns with -1e30 (not 0): padded lanes drop out of
    # max/logsumexp with no in-kernel masking; they are sliced off below.
    table_p = jnp.pad(jnp.asarray(table, jnp.float32),
                      ((0, v_rows - V), (0, v_lanes - table.shape[1])),
                      constant_values=_NEG_BIG)
    idx_col = jnp.pad(idx.reshape(BT).astype(jnp.int32),
                      (0, bt_pad - BT)).reshape(bt_pad, 1)

    cparams = _compiler_params(tile, v_rows, v_lanes, emit_logits)
    cost = _cost(bt_pad, v_lanes, v_rows, train, emit_logits)

    idx_spec = pl.BlockSpec((tile, 1), lambda i: (i, 0))
    tab_spec = pl.BlockSpec((v_rows, v_lanes), lambda i: (0, 0))     # resident
    log_spec = pl.BlockSpec((tile, v_lanes), lambda i: (i, 0))

    if not train:
        def build(use_gather):
            return pl.pallas_call(
                _make_infer_kernel(tile, v_rows, use_gather),
                out_shape=jax.ShapeDtypeStruct((bt_pad, v_lanes), jnp.float32),
                grid=(n_tiles,),
                in_specs=[idx_spec, tab_spec],
                out_specs=log_spec,
                compiler_params=cparams,
                cost_estimate=cost)

        structs = (jax.ShapeDtypeStruct(idx_col.shape, idx_col.dtype),
                   jax.ShapeDtypeStruct(table_p.shape, table_p.dtype))
        use_gather = _pick_gather(build, structs,
                                  ("infer", tile, n_tiles, v_rows, v_lanes))
        logits_p = build(use_gather)(idx_col, table_p)
        return logits_p[:BT, :V].reshape(B, T, V), None

    tgt_col = jnp.pad(targets.reshape(BT).astype(jnp.int32),
                      (0, bt_pad - BT)).reshape(bt_pad, 1)

    out_shapes, out_specs = [], []
    if emit_logits:
        out_shapes.append(jax.ShapeDtypeStruct((bt_pad, v_lanes), jnp.float32))
        out_specs.append(log_spec)
    out_shapes.append(jax.ShapeDtypeStruct((bt_pad, 1), jnp.float32))
    out_specs.append(pl.BlockSpec((tile, 1), lambda i: (i, 0)))

    def build(use_gather):
        return pl.pallas_call(
            _make_train_kernel(tile, v_lanes, v_rows, BT, use_gather,
                               emit_logits),
            out_shape=tuple(out_shapes),
            grid=(n_tiles,),
            in_specs=[idx_spec, idx_spec, tab_spec],
            out_specs=tuple(out_specs),
            compiler_params=cparams,
            cost_estimate=cost)

    structs = (jax.ShapeDtypeStruct(idx_col.shape, idx_col.dtype),
               jax.ShapeDtypeStruct(tgt_col.shape, tgt_col.dtype),
               jax.ShapeDtypeStruct(table_p.shape, table_p.dtype))
    use_gather = _pick_gather(
        build, structs,
        ("train", emit_logits, tile, n_tiles, v_rows, v_lanes))
    outs = build(use_gather)(idx_col, tgt_col, table_p)

    if emit_logits:
        logits_p, per_token = outs
        logits = logits_p[:BT, :V]
    else:
        (per_token,) = outs
        logits = None
    loss = jnp.sum(per_token) / BT       # padded rows were zeroed in-kernel
    return logits, loss


# TODO(synk): generate() (autoregressive torch.multinomial sampling loop) is
# host-driven control flow around this forward pass and is not a kernel.
def bigram_forward(idx, table, targets=None, *, tile_bt=2048, return_logits=True):
    """Forward pass of BigramLanguageModel.

    idx: (B, T) int32; table: (V, V) float32; targets: optional (B, T) int32.
    Returns (logits, loss): logits is (B*T, V) when targets are given
    (matching PyTorch's view(B*T, C)), else (B, T, V) with loss None.
    With return_logits=False and targets given, returns (None, loss) and the
    kernel skips the logits HBM store entirely.
    """
    return _forward_impl(idx, table, targets, tile_bt, return_logits)


if __name__ == "__main__":
    # Small deterministic setup consistent with the module:
    # vocab_size = 65 (tiny-Shakespeare-like), batch B=2, seq T=8.
    vocab_size = 65
    B, T = 2, 8

    key = jax.random.PRNGKey(0)
    k_tab, k_idx, k_tgt = jax.random.split(key, 3)

    # nn.Embedding default init is N(0, 1).
    table = jax.random.normal(k_tab, (vocab_size, vocab_size), dtype=jnp.float32)
    idx = jax.random.randint(k_idx, (B, T), 0, vocab_size, dtype=jnp.int32)
    targets = jax.random.randint(k_tgt, (B, T), 0, vocab_size, dtype=jnp.int32)

    # Pure-JAX reference (embedding gather + mean cross entropy).
    ref_logits = table[idx.reshape(-1)]
    ref_lse = jax.scipy.special.logsumexp(ref_logits, axis=-1)
    ref_tl = jnp.take_along_axis(ref_logits, targets.reshape(-1, 1), axis=-1)[:, 0]
    ref_loss = jnp.mean(ref_lse - ref_tl)

    # 1) Training path (logits + loss), matches PyTorch forward with targets.
    logits, loss = bigram_forward(idx, table, targets)
    logits = jax.block_until_ready(logits)
    loss = jax.block_until_ready(loss)
    assert logits.shape == (B * T, vocab_size)
    assert jnp.allclose(logits, ref_logits, atol=1e-5)
    assert jnp.allclose(loss, ref_loss, atol=1e-5)

    # 2) Loss-only training path (skips the logits HBM store).
    none_logits, loss_only = bigram_forward(idx, table, targets,
                                            return_logits=False)
    loss_only = jax.block_until_ready(loss_only)
    assert none_logits is None
    assert jnp.allclose(loss_only, ref_loss, atol=1e-5)

    # 3) Inference path (targets=None): logits-only kernel, no CE work.
    logits_bt, loss_none = bigram_forward(idx, table, None)
    logits_bt = jax.block_until_ready(logits_bt)
    assert logits_bt.shape == (B, T, vocab_size)
    assert loss_none is None
    assert jnp.allclose(logits_bt.reshape(B * T, vocab_size), ref_logits,
                        atol=1e-5)

    print("KERNEL_OK")
</pallas_src>

<mosaic_0001>
module attributes {stable_mosaic.version = 11 : i64} {
  func.func @kernel(%arg0: i32, %arg1: memref<8x1xi32, #tpu.memory_space<vmem>>, %arg2: memref<8x1xi32, #tpu.memory_space<vmem>>, %arg3: memref<72x128xf32, #tpu.memory_space<vmem>>, %arg4: memref<8x128xf32, #tpu.memory_space<vmem>>, %arg5: memref<8x1xf32, #tpu.memory_space<vmem>>) attributes {dimension_semantics = [#tpu.dimension_semantics<parallel>], iteration_bounds = array<i64: 2>, scalar_prefetch = 0 : i64, scratch_operands = 0 : i64, tpu.core_type = #tpu.core_type<tc>, window_params = [{transform_indices = @transform_0, window_bounds = array<i64: 8, 1>}, {transform_indices = @transform_1, window_bounds = array<i64: 8, 1>}, {pipeline_mode = #tpu.pipeline_mode<synchronous>, transform_indices = @transform_2, window_bounds = array<i64: 72, 128>}, {transform_indices = @transform_3, window_bounds = array<i64: 8, 128>}, {transform_indices = @transform_4, window_bounds = array<i64: 8, 1>}]} {
    %c0 = arith.constant 0 : index
    %c0_0 = arith.constant 0 : index
    %0 = vector.load %arg1[%c0, %c0_0] : memref<8x1xi32, #tpu.memory_space<vmem>>, vector<8x1xi32>
    %c0_1 = arith.constant 0 : index
    %c0_2 = arith.constant 0 : index
    %1 = vector.load %arg3[%c0_1, %c0_2] : memref<72x128xf32, #tpu.memory_space<vmem>>, vector<72x128xf32>
    %2 = tpu.iota {dimensions = array<i32: 1>} : vector<8x72xi32>
    %3 = vector.broadcast %0 : vector<8x1xi32> to vector<8x72xi32>
    %4 = arith.cmpi eq, %2, %3 : vector<8x72xi32>
    %5 = arith.extui %4 : vector<8x72xi1> to vector<8x72xi32>
    %6 = arith.sitofp %5 : vector<8x72xi32> to vector<8x72xf32>
    %cst = arith.constant dense<0.000000e+00> : vector<8x128xf32>
    %7 = tpu.matmul %6, %1, %cst {dimension_numbers = #tpu.dot_dimension_numbers<[1], [0], [0], [1], [0, 0, 1, 1], [], []>, precision = #tpu.contract_precision<fp32>} : vector<8x72xf32>, vector<72x128xf32>, vector<8x128xf32> -> vector<8x128xf32>
    %c0_3 = arith.constant 0 : index
    %c0_4 = arith.constant 0 : index
    %8 = vector.load %arg4[%c0_3, %c0_4] : memref<8x128xf32, #tpu.memory_space<vmem>>, vector<8x128xf32>
    tpu.vector_store %arg4[%c0_3, %c0_4], %7 {strides = array<i32>} : memref<8x128xf32, #tpu.memory_space<vmem>>, vector<8x128xf32>,
    %cst_5 = arith.constant dense<0xFF800000> : vector<8xf32>
    %9 = vector.multi_reduction <maximumf>, %7, %cst_5 [1] : vector<8x128xf32> to vector<8xf32>
    %10 = vector.shape_cast %9 : vector<8xf32> to vector<8x1xf32>
    %11 = vector.broadcast %10 : vector<8x1xf32> to vector<8x128xf32>
    %12 = arith.subf %7, %11 : vector<8x128xf32>
    %13 = math.exp %12 : vector<8x128xf32>
    %cst_6 = arith.constant dense<0.000000e+00> : vector<8xf32>
    %14 = vector.multi_reduction <add>, %13, %cst_6 [1] : vector<8x128xf32> to vector<8xf32>
    %15 = vector.shape_cast %14 : vector<8xf32> to vector<8x1xf32>
    %16 = math.log %15 : vector<8x1xf32>
    %17 = arith.addf %10, %16 : vector<8x1xf32>
    %18 = tpu.iota {dimensions = array<i32: 1>} : vector<8x128xi32>
    %c0_7 = arith.constant 0 : index
    %c0_8 = arith.constant 0 : index
    %19 = vector.load %arg2[%c0_7, %c0_8] : memref<8x1xi32, #tpu.memory_space<vmem>>, vector<8x1xi32>
    %20 = vector.broadcast %19 : vector<8x1xi32> to vector<8x128xi32>
    %21 = arith.cmpi eq, %18, %20 : vector<8x128xi32>
    %cst_9 = arith.constant 0.000000e+00 : f32
    %22 = vector.broadcast %cst_9 : f32 to vector<8x128xf32>
    %23 = arith.select %21, %7, %22 : vector<8x128xi1>, vector<8x128xf32>
    %cst_10 = arith.constant dense<0.000000e+00> : vector<8xf32>
    %24 = vector.multi_reduction <add>, %23, %cst_10 [1] : vector<8x128xf32> to vector<8xf32>
    %25 = vector.shape_cast %24 : vector<8xf32> to vector<8x1xf32>
    %26 = tpu.iota {dimensions = array<i32: 0>} : vector<8x1xi32>
    %c8_i32 = arith.constant 8 : i32
    %27 = arith.muli %arg0, %c8_i32 : i32
    %28 = vector.broadcast %27 : i32 to vector<8x1xi32>
    %29 = arith.addi %28, %26 : vector<8x1xi32>
    %c16_i32 = arith.constant 16 : i32
    %30 = vector.broadcast %c16_i32 : i32 to vector<8x1xi32>
    %31 = arith.cmpi slt, %29, %30 : vector<8x1xi32>
    %32 = arith.subf %17, %25 : vector<8x1xf32>
    %cst_11 = arith.constant 0.000000e+00 : f32
    %33 = vector.broadcast %cst_11 : f32 to vector<8x1xf32>
    %34 = arith.select %31, %32, %33 : vector<8x1xi1>, vector<8x1xf32>
    %c0_12 = arith.constant 0 : index
    %c0_13 = arith.constant 0 : index
    %35 = vector.load %arg5[%c0_12, %c0_13] : memref<8x1xf32, #tpu.memory_space<vmem>>, vector<8x1xf32>
    tpu.vector_store %arg5[%c0_12, %c0_13], %34 {strides = array<i32>} : memref<8x1xf32, #tpu.memory_space<vmem>>, vector<8x1xf32>,
    return
  }
  func.func @transform_0(%arg0: i32) -> (i32, i32) {
    %c0_i32 = arith.constant 0 : i32
    %c0_i32_0 = arith.constant 0 : i32
    return %arg0, %c0_i32 : i32, i32
  }
  func.func @transform_1(%arg0: i32) -> (i32, i32) {
    %c0_i32 = arith.constant 0 : i32
    %c0_i32_0 = arith.constant 0 : i32
    return %arg0, %c0_i32 : i32, i32
  }
  func.func @transform_2(%arg0: i32) -> (i32, i32) {
    %c0_i32 = arith.constant 0 : i32
    %c0_i32_0 = arith.constant 0 : i32
    %c0_i32_1 = arith.constant 0 : i32
    return %c0_i32, %c0_i32_0 : i32, i32
  }
  func.func @transform_3(%arg0: i32) -> (i32, i32) {
    %c0_i32 = arith.constant 0 : i32
    %c0_i32_0 = arith.constant 0 : i32
    return %arg0, %c0_i32 : i32, i32
  }
  func.func @transform_4(%arg0: i32) -> (i32, i32) {
    %c0_i32 = arith.constant 0 : i32
    %c0_i32_0 = arith.constant 0 : i32
    return %arg0, %c0_i32 : i32, i32
  }
}

</mosaic_0001>

<bundles_post_ra>
// kernel: tpu_custom_call.1
= control target key start
LH: loop header
LB: loop body
LE: loop exit
PB: predicated region body
PF: predicated region fallthrough
CT: control target
= control target key end

     0   :  { %10 = vsyncpa [#allocation3], 0  ;;  %s1705_s0 = inlined_call_operand.vmem [shape: s32[16,1], index: 0, kind: input, shape index: {}]   ;;  %s1706_s1 = inlined_call_operand.vmem [shape: s32[16,1], index: 1, kind: input, shape index: {}]   ;;  %s1707_s2 = inlined_call_operand.hbm [shape: f32[72,128], index: 2, kind: input, shape index: {}]   ;;  %s1708_s3 = inlined_call_operand.hbm [shape: f32[16,128], index: 3, kind: output, shape index: {0}]   ;;  %s1709_s4 = inlined_call_operand.vmem [shape: f32[16,1], index: 4, kind: output, shape index: {1}]  }
   0x1   :  { %11 = vsyncpa [#allocation4], 0 }
   0x2   :  { %13 = vsyncpa [#allocation4 + $0x1], 0  ;;  %s1442_s15 = smov 0   ;;  %s1444_s16 = smov 0  }
   0x3   :  { %s1446_s17 = smov 0   ;;  %s1448_s18 = smov 0  }
   0x4 LB: > { %s1463_s19 = sadd.s32 4294967295, %s1407_s18   ;;  %s965_s20 = sadd.s32 4294967294, %s1407_s18   ;;  %s1407_s18 = sphi %s1448_s18, %s1725_s18   ;;  %s1403_s17 = sphi %s1446_s17, %s1724_s17   ;;  %s1399_s16 = sphi %s1444_s16, %s1723_s16   ;;  %s1395_s15 = sphi %s1442_s15, %s1722_s15  }
   0x5   : > { %s1467_s21 = sadd.s32 1, %s1407_s18   ;;  %s99_s22 = sadd.s32 1, %s1403_s17 }
   0x6   : > { %s96_s23 = ssub.s32 %s1407_s18, %s1467_s21  ;;  %p109_p0 = scmp.ne.s32.totalorder %s1403_s17, %s1399_s16 }
   0x7   : > { %p97_p1 = scmp.eq.s32.totalorder %s96_s23, 0  ;;  %p110_p2 = scmp.eq.s32.totalorder %s1463_s19, 1 }
   0x8   : > { %p115_p3 = scmp.ne.s32.totalorder %s1399_s16, %s1395_s15  ;;  %p116_p4 = scmp.eq.s32.totalorder %s965_s20, 1 }
   0x9   : > { %s1478_s24 = scalar_select %p97_p1, %s1403_s17, %s99_s22  }
   0xa   : > { %p1480_p5 = por %p110_p2, %p109_p0  ;;  %p1484_p6 = por %p116_p4, %p115_p3 }
   0xb   : > { %p966_p7 = scmp.ge.s32.totalorder %s1407_s18, 1  ;;  %p149_p8 = scmp.lt.s32.totalorder %s1407_s18, 3 }
   0xc   : > { %s1713_s25 = scalar_select %p1480_p5, 1, 0 }
   0xd   : > { %s1714_s26 = scalar_select %p1484_p6, 1, 0 }
   0xe   : > { %p1710_p9 = scmp.eq.s32.totalorder %s1463_s19, 0  ;;  %p1491_p10 = pnand %p966_p7, %p149_p8 }
   0xf   : > { %s1409_s28 = smov [#allocation2]   ;;  %s1313_s7 = scalar_lea.hbm %s1707_s2, 1152 }
  0x10   : > { %s1715_s27 = scalar_select %p1491_p10, 1, 0 }
  0x11   : > { %s161_s29 = sshll.u32 %s1409_s28, 4  ;;  %p1257_p11 = pneg %p1491_p10  ;;  %s162_s29 = int_to_ptr.vmem [resolvable:$true] %s161_s29 }
  0x12   : > { %p1314_p13 = scmp.ne.s32.totalorder %s1707_s2, %s1313_s7  ;;  %p1320_p3 = scmp.lt.u32.totalorder %s1313_s7, %s1707_s2 }
  0x13   : > { %p1499_p12 = pnand %p1710_p9, %p1257_p11 }
  0x15   : > { %p1315_p0 = pneg %p1499_p12 }
  0x17   : > { %p1316_p1 = pnand %p1315_p0, %p1314_p13 }
  0x19   : > { %p1317_p2 = pneg %p1316_p1 }
  0x1b   : > { %p1322_p4 = pnand %p1320_p3, %p1317_p2 }
  0x1d   : > { %1325 = shalt.err (!%p1322_p4)
}
  0x1e   : > { %s1326_s12 = scalar_lea.vmem %s162_s29, 1152  ;;  %p1334_p9 = scmp.lt.s32.totalorder %s162_s29, %s162_s29 }
  0x1f   : > { %p1327_p7 = scmp.ne.s32.totalorder %s162_s29, %s1326_s12  ;;  %p1335_p6 = scmp.lt.s32.totalorder %s1326_s12, %s1326_s12 }
  0x21   : > { %p1329_p8 = pnand %p1327_p7, %p1315_p0  ;;  %p1336_p5 = por %p1335_p6, %p1334_p9 }
  0x23   : > { %p1330_p11 = pneg %p1329_p8 }
  0x25   : > { %p1337_p10 = pnand %p1336_p5, %p1330_p11 }
  0x27   : > { %1340 = shalt.err (!%p1337_p10)
}
  0x28   : > { %s1410_s13 = smov 128   ;;  %s1411_s14 = smov 8  }
  0x29   : > { %1260 = dma.hbm_to_vmem [thread:$0]  (!%p1499_p12), %s1707_s2, 1152, %s162_s29, [#allocation3], %s1410_s13, %s1410_s13, %s1411_s14  }
  0x2a   : > { %p1717_p13 = scmp.ne.s32.totalorder %s1715_s27, 0 }
  0x2b   : > { %p1718_p1 = scmp.eq.s32.totalorder (!%p1717_p13), %s1463_s19, 0 }
  0x2c   : > { %191 = sbr.rel (%p1717_p13) target bundleno = 766 (0x2fe), region = 32 }
  0x33   : > { %1386 = dma.done.wait (%p1718_p1), [#allocation3], 1152   ;;  %p1719_p0 = pmov %p1718_p1 }
  0x34   : > { %p224_p5 = scmp.lt.s32.totalorder %s1463_s19, 1  ;;  %v1412_v0 = vmov 0   ;;  %v1413_v1 = vmov 0.0|0.0   ;;  %v237_v3 = vld [vmem:[#allocation2] sm:$0xff]  ;;  %v238_v4 = vld [vmem:[#allocation2 + $0x8] sm:$0xff]  ;;  %v239_v7 = vld [vmem:[#allocation2 + $0x10] sm:$0xff] }
  0x35   : > { %1388 = vsyncadd (%p1719_p0), [#allocation3], 4294966144  ;;  %1307 = vset.pattern.permute.xlu0 %v1412_v0  ;;  %1206 = vmatprep.subr.bf16.mxu0 %v1413_v1  ;;  %v259_v5 = vand.u32 4294901760, %v237_v3  ;;  %v262_v6 = vand.u32 4294901760, %v238_v4  ;;  %v240_v8 = vld [vmem:[#allocation2 + $0x18] sm:$0xff]  ;;  %v241_v9 = vld [vmem:[#allocation2 + $0x20] sm:$0xff] }
  0x36   : > { %s225_s23 = scalar_select %p224_p5, %s1463_s19, 1  ;;  %1170 = vmatprep.subr.bf16.mxu1 %v1413_v1  ;;  %1308 = vset.pattern.permute.xlu1 %v1412_v0  ;;  %v265_v10 = vand.u32 4294901760, %v239_v7  ;;  %v268_v11 = vand.u32 4294901760, %v240_v8  ;;  %v242_v12 = vld [vmem:[#allocation2 + $0x28] sm:$0xff]  ;;  %v271_v13 = vand.u32 4294901760, %v241_v9  ;;  %v243_v14 = vld [vmem:[#allocation2 + $0x30] sm:$0xff] }
  0x37   : > { %v244_v15 = vld [vmem:[#allocation2 + $0x38] sm:$0xff]  ;;  %v1535_v16 = vpack.c.bf16 %v262_v6, %v259_v5  ;;  %v1537_v17 = vsub.f32 %v237_v3, %v259_v5  ;;  %v1539_v18 = vsub.f32 %v238_v4, %v262_v6  ;;  %v274_v19 = vand.u32 4294901760, %v242_v12  ;;  %v245_v45 = vld [vmem:[#allocation2 + $0x40] sm:$0xff]  ;;  %s215_s8 = sand.u32 1, %s1399_s16   ;;  %s981_s11 = sshll.u32 %s1463_s19, 7 }
  0x38   : > { %s1529_s27 = sshll.u32 %s225_s23, 3  ;;  %v1541_v20 = vsub.f32 %v239_v7, %v265_v10  ;;  %v1543_v21 = vsub.f32 %v240_v8, %v268_v11  ;;  %v1545_v22 = vsub.f32 %v241_v9, %v271_v13  ;;  %v1549_v23 = vpack.c.bf16 %v268_v11, %v265_v10  ;;  %s971_s9 = sshll.u32 %s215_s8, 3 }
  0x39   : > { %s227_s30 = scalar_lea.vmem %s1705_s0, %s1529_s27  ;;  %1208 = vmatpush3.bf16.msra.mxu0 %v1535_v16  ;;  %1172 = vmatpush3.bf16.msra.mxu1 %v1535_v16  ;;  %v1551_v24 = vsub.f32 %v242_v12, %v274_v19  ;;  %v277_v25 = vand.u32 4294901760, %v243_v14  ;;  %v280_v26 = vand.u32 4294901760, %v244_v15  ;;  %v345_v27 = vand.u32 4294901760, %v1537_v17  ;;  %s231_s7 = scalar_lea.vmem %s1706_s1, %s1529_s27 }
  0x3a   : > { %v236_v2 = vld [vmem:[%s227_s30] sm:$0xff]  ;;  %1209 = vmatprep.subr.bf16.mxu0 %v1413_v1  ;;  %1173 = vmatprep.subr.bf16.mxu1 %v1413_v1  ;;  %v352_v28 = vand.u32 4294901760, %v1539_v18  ;;  %vm1414_vm0 = vmmov 0   ;;  %v1415_v31 = vmov 0.0   ;;  %v1571_v35 = vpack.c.bf16 %v274_v19, %v271_v13  ;;  %s217_s10 = scalar_lea.vmem [#allocation5], %s971_s9  ;;  %s1663_s20 = scalar_lea.hbm %s1708_s3, %s981_s11 }
  0x3b   : > { %249 = vperm.xlu0 %1307, %v236_v2   ;;  %v1557_v29 = vsub.f32 %v243_v14, %v277_v25  ;;  %v1559_v30 = vsub.f32 %v244_v15, %v280_v26  ;;  %1125 = vmatprep.mubr.msk.f32.mxu0 %vm1414_vm0, %v1415_v31  ;;  %v346_v33 = vsub.f32 %v1537_v17, %v345_v27  ;;  %v359_v36 = vand.u32 4294901760, %v1541_v20  ;;  %v819_v7 = vld [vmem:[%s231_s7] sm:$0xff]  ;;  %s855_s12 = sshll.u32 %s217_s10, 4  ;;  %s838_s22 = scalar_lea.sflag [#allocation4], %s215_s8  ;;  %s856_s12 = int_to_ptr.vmem [resolvable:$true] %s855_s12 }
  0x3c   : > { %1062 = vmatprep.mubr.msk.f32.mxu1 %vm1414_vm0, %v1415_v31  ;;  %v1565_v32 = vpack.c.bf16 %v352_v28, %v345_v27  ;;  %v353_v34 = vsub.f32 %v1539_v18, %v352_v28  ;;  %v366_v37 = vand.u32 4294901760, %v1543_v21  ;;  %v1579_v43 = vpack.c.bf16 %v280_v26, %v277_v25  ;;  %821 = vperm.xlu1 %1308, %v819_v7   ;;  %s1341_s23 = scalar_lea.vmem %s856_s12, 128  ;;  %p1720_p9 = scmp.ne.s32.totalorder %s1713_s25, 0 }
  0x3d   : > { %1211 = vmatpush3.bf16.msra.mxu0 %v1549_v23  ;;  %1175 = vmatpush3.bf16.msra.mxu1 %v1549_v23  ;;  %v347_v38 = vand.u32 4294901760, %v346_v33  ;;  %v360_v41 = vsub.f32 %v1541_v20, %v359_v36  ;;  %v373_v48 = vand.u32 4294901760, %v1545_v22  ;;  %v380_v49 = vand.u32 4294901760, %v1551_v24  ;;  %p1342_p6 = scmp.ne.s32.totalorder %s856_s12, %s1341_s23  ;;  %s1416_s28 = smov [#allocation5]  }
  0x3e   : > { %1212 = vmatprep.subr.bf16.mxu0 %v1413_v1  ;;  %1176 = vmatprep.subr.bf16.mxu1 %v1413_v1  ;;  %v354_v39 = vand.u32 4294901760, %v353_v34  ;;  %v1222_v40 = vpack.c.bf16 %v366_v37, %v359_v36  ;;  %v367_v42 = vsub.f32 %v1543_v21, %v366_v37  ;;  %v1589_v54 = vand.u32 4294901760, %v245_v45  ;;  %s1345_s29 = sshll.u32 %s1416_s28, 4  ;;  %s1346_s29 = int_to_ptr.vmem [resolvable:$false] %s1345_s29 }
  0x3f   : > { %v361_v46 = vand.u32 4294901760, %v360_v41  ;;  %v1225_v51 = vpack.c.bf16 %v380_v49, %v373_v48  ;;  %v374_v52 = vsub.f32 %v1545_v22, %v373_v48  ;;  %v381_v53 = vsub.f32 %v1551_v24, %v380_v49  ;;  %p1343_p10 = pnand %p1342_p6, %p1720_p9  ;;  %s1347_s30 = scalar_lea.vmem %s1346_s29, 256 }
  0x40   : > { %v1183_v44 = vpack.c.bf16 %v354_v39, %v347_v38  ;;  %v368_v47 = vand.u32 4294901760, %v367_v42  ;;  %v387_v57 = vand.u32 4294901760, %v1557_v29  ;;  %v394_v58 = vand.u32 4294901760, %v1559_v30  ;;  %p1348_p2 = scmp.lt.s32.totalorder %s856_s12, %s1346_s29  ;;  %p1349_p3 = scmp.lt.s32.totalorder %s1347_s30, %s1341_s23 }
  0x41   : > { %1214 = vmatpush3.bf16.msra.mxu0 %v1571_v35  ;;  %1178 = vmatpush3.bf16.msra.mxu1 %v1571_v35  ;;  %v375_v55 = vand.u32 4294901760, %v374_v52  ;;  %v382_v56 = vand.u32 4294901760, %v381_v53  ;;  %v1195_v3 = vpack.c.bf16 %v1539_v18, %v1537_v17  ;;  %v1198_v4 = vpack.c.bf16 %v1543_v21, %v1541_v20  ;;  %p1344_p12 = pneg %p1343_p10 }
  0x42   : > { %1215 = vmatprep.subr.bf16.mxu0 %v1413_v1  ;;  %1179 = vmatprep.subr.bf16.mxu1 %v1413_v1  ;;  %v1186_v50 = vpack.c.bf16 %v368_v47, %v361_v46  ;;  %v1228_v60 = vpack.c.bf16 %v394_v58, %v387_v57  ;;  %v388_v61 = vsub.f32 %v1557_v29, %v387_v57  ;;  %v246_v8 = vlaneseq  ;;  %p1350_p4 = por %p1349_p3, %p1348_p2 }
  0x43   : > { %v1189_v59 = vpack.c.bf16 %v382_v56, %v375_v55  ;;  %v395_v62 = vsub.f32 %v1559_v30, %v394_v58  ;;  %v1201_v5 = vpack.c.bf16 %v1551_v24, %v1545_v22  ;;  %v1204_v6 = vpack.c.bf16 %v1559_v30, %v1557_v29 }
  0x44   : > { %v389_v63 = vand.u32 4294901760, %v388_v61  ;;  %v1616_v9 = vand.u32 127, %v246_v8  ;;  %vm254_vm1 = vcmask 588800   ;;  %v400_v18 = vsub.f32 %v245_v45, %v1589_v54  ;;  %p1351_p7 = pnand %p1350_p4, %p1344_p12 }
  0x45   : > { %1217 = vmatpush3.bf16.msra.mxu0 %v1579_v43  ;;  %1181 = vmatpush3.bf16.msra.mxu1 %v1579_v43  ;;  %v396_v0 = vand.u32 4294901760, %v395_v62 }
  0x46   : > { %1123 = vmatprep.subr.mxu0 %v1415_v31  ;;  %1060 = vmatprep.subr.mxu1 %v1415_v31  ;;  %v401_v19 = vand.u32 4294901760, %v400_v18 }
  0x47   : > { %v1192_v2 = vpack.c.bf16 %v396_v0, %v389_v63 }
  0x48   : > { %v402_v20 = vsub.f32 %v400_v18, %v401_v19 }
  0x49   : > { %1124 = vmatpush3.msra.mxu0 %v1589_v54  ;;  %1061 = vmatpush3.msra.mxu1 %v1589_v54 }
  0x4a   : > { %1218 = vmatprep.subr.bf16.mxu0 %v1413_v1  ;;  %1182 = vmatprep.subr.bf16.mxu1 %v1413_v1  ;;  %v403_v21 = vand.u32 4294901760, %v402_v20 }
  0xba   : > { %v250_v10 = vpop.permute.xlu0 %249 }
  0xbb   : > { %vm251_vm2 = vcmp.eq.s32.totalorder %v1616_v9, %v250_v10  ;;  %v822_v24 = vpop.permute.xlu1 %821 }
  0xbc   : > { %v975_v11 = vsel %vm251_vm2, 1.0, %v1415_v31  ;;  %vm823_vm3 = vcmp.eq.s32.totalorder %v1616_v9, %v822_v24 }
  0xbd   : > { %v256_v12 = vsel %vm254_vm1, %v975_v11, 0 }
  0xbe   : > { %v333_v13 = vsub.f32 %v256_v12, %v256_v12 }
  0xc0   : > { %v334_v14 = vand.u32 4294901760, %v333_v13 }
  0xc2   : > { %1126 = vmatmul.mubr.f32.vlgmr.msra.gmra.mrb[0].mxu0 %v334_v14  ;;  %v335_v15 = vsub.f32 %v333_v13, %v334_v14 }
  0xc3   : > { %1220 = vmatpush3.bf16.msra.mxu0 %v1565_v32  ;;  %1146 = vmatprep.mubr.msk.f32.mxu0 %vm1414_vm0, %v1415_v31 }
  0xc4   : > { %1221 = vmatprep.subr.bf16.mxu0 %v1413_v1  ;;  %v336_v17 = vand.u32 4294901760, %v335_v15 }
  0xc6   : > { %1063 = vmatmul.mubr.f32.vlgmr.msra.gmra.mrb[0].mxu1 %v336_v17 }
  0xc7   : > { %1184 = vmatpush3.bf16.msra.mxu1 %v1183_v44  ;;  %1223 = vmatpush3.bf16.msra.mxu0 %v1222_v40 }
  0xc8   : > { %1185 = vmatprep.subr.bf16.mxu1 %v1413_v1  ;;  %1224 = vmatprep.subr.bf16.mxu0 %v1413_v1 }
  0xc9   : > { %1083 = vmatprep.mubr.msk.f32.mxu1 %vm1414_vm0, %v1415_v31 }
  0xcb   : > { %1187 = vmatpush3.bf16.msra.mxu1 %v1186_v50  ;;  %1226 = vmatpush3.bf16.msra.mxu0 %v1225_v51 }
  0xcc   : > { %1188 = vmatprep.subr.bf16.mxu1 %v1413_v1  ;;  %1227 = vmatprep.subr.bf16.mxu0 %v1413_v1 }
  0xcf   : > { %1190 = vmatpush3.bf16.msra.mxu1 %v1189_v59  ;;  %1229 = vmatpush3.bf16.msra.mxu0 %v1228_v60 }
  0xd0   : > { %1191 = vmatprep.subr.bf16.mxu1 %v1413_v1  ;;  %1144 = vmatprep.subr.mxu0 %v1415_v31 }
  0xd3   : > { %1193 = vmatpush3.bf16.msra.mxu1 %v1192_v2  ;;  %1145 = vmatpush3.msra.mxu0 %v401_v19 }
  0xd4   : > { %1147 = vmatmul.mubr.msk.f32.vlgmr.msra.gmra.mrb[0].mxu0 %vm254_vm1, %v975_v11  ;;  %1230 = vmatprep.subr.bf16.mxu0 %v1413_v1 }
  0xd5   : > { %1232 = vmatpush3.bf16.msra.mxu0 %v1535_v16  ;;  %1081 = vmatprep.subr.mxu1 %v1415_v31 }
  0xd6   : > { %1233 = vmatprep.subr.bf16.mxu0 %v1413_v1  ;;  %1167 = vmatprep.mubr.msk.f32.mxu0 %vm1414_vm0, %v1415_v31 }
  0xd7   : > { %1082 = vmatpush3.msra.mxu1 %v403_v21 }
  0xd8   : > { %1084 = vmatmul.mubr.msk.f32.vlgmr.msra.gmra.mrb[0].mxu1 %vm254_vm1, %v975_v11  ;;  %1194 = vmatprep.subr.bf16.mxu1 %v1413_v1 }
  0xd9   : > { %1196 = vmatpush3.bf16.msra.mxu1 %v1195_v3  ;;  %1235 = vmatpush3.bf16.msra.mxu0 %v1549_v23 }
  0xda   : > { %1197 = vmatprep.subr.bf16.mxu1 %v1413_v1  ;;  %1236 = vmatprep.subr.bf16.mxu0 %v1413_v1 }
  0xdb   : > { %1104 = vmatprep.mubr.msk.f32.mxu1 %vm1414_vm0, %v1415_v31 }
  0xdd   : > { %1199 = vmatpush3.bf16.msra.mxu1 %v1198_v4  ;;  %1238 = vmatpush3.bf16.msra.mxu0 %v1571_v35 }
  0xde   : > { %1200 = vmatprep.subr.bf16.mxu1 %v1413_v1  ;;  %1239 = vmatprep.subr.bf16.mxu0 %v1413_v1 }
  0xe1   : > { %1202 = vmatpush3.bf16.msra.mxu1 %v1201_v5  ;;  %1241 = vmatpush3.bf16.msra.mxu0 %v1579_v43 }
  0xe2   : > { %1203 = vmatprep.subr.bf16.mxu1 %v1413_v1  ;;  %1165 = vmatprep.subr.mxu0 %v1415_v31 }
  0xe5   : > { %1205 = vmatpush3.bf16.msra.mxu1 %v1204_v6  ;;  %1166 = vmatpush3.msra.mxu0 %v1589_v54 }
  0xe6   : > { %1168 = vmatmul.mubr.msk.f32.vlgmr.msra.gmra.mrb[0].mxu0 %vm254_vm1, %v975_v11  ;;  %1102 = vmatprep.subr.mxu1 %v1415_v31 }
  0xe9   : > { %1103 = vmatpush3.msra.mxu1 %v400_v18 }
  0xea   : > { %1105 = vmatmul.mubr.f32.vlgmr.msra.gmra.mrb[0].mxu1 %v333_v13 }
 0x1b9   : > { %v804_v16 = vpop.f32.mrb[0].mxu0 }
 0x1ba   : > { %v1169_v22 = vpop.f32.mrb[1].mxu0 }
 0x1bd   : > { %v544_v23 = vpop.f32.mrb[0].mxu1 }
 0x1be   : > { %v1242_v25 = vadd.f32 %v804_v16, %v544_v23  ;;  %v1106_v1 = vpop.f32.mrb[1].mxu1 }
 0x1c0   : > { %809 = vmax.xlane.f32.xlu0 %v1242_v25  ;;  %808 = vst [vmem:[%s217_s10] sm:$0xff] %v1242_v25  ;;  %v824_v26 = vsel %vm823_vm3, %v1242_v25, 0.0 }
 0x1c4   : > { %825 = vadd.xlane.f32.xlu0 %v824_v26 }
 0x24d   : > { %v810_v27 = vpop.xlane.xlu0 %809 }
 0x24e   : > { %v811_v28 = vsub.f32 %v1242_v25, %v810_v27 }
 0x250   : > { %v812_v29 = vmul.f32 1.442695, %v811_v28 }
 0x252   : > { %1309 = vpow2.f32 %v812_v29 }
 0x25c   : > { %v1310_v30 = vpop.eup %1309 }
 0x25d   : > { %814 = vadd.xlane.f32.xlu1 %v1310_v30 }
 0x25e   : > { %1354 = shalt.err (!%p1351_p7)
}
 0x25f   : > { %s1355_s5 = scalar_lea.hbm %s1663_s20, 128  ;;  %s1359_s8 = scalar_lea.hbm %s1708_s3, 256 }
 0x260   : > { %p1356_p8 = scmp.ne.s32.totalorder %s1663_s20, %s1355_s5  ;;  %p1360_p1 = scmp.lt.u32.totalorder %s1663_s20, %s1708_s3 }
 0x261   : > { %p1361_p0 = scmp.lt.u32.totalorder %s1359_s8, %s1355_s5  ;;  %p1363_p6 = scmp.lt.u32.totalorder %s1355_s5, %s1663_s20 }
 0x262   : > { %p1357_p11 = pnand %p1356_p8, %p1720_p9 }
 0x263   : > { %p1362_p5 = por %p1361_p0, %p1360_p1 }
 0x264   : > { %p1358_p13 = pneg %p1357_p11 }
 0x265   : > { %p1364_p10 = por %p1363_p6, %p1362_p5 }
 0x267   : > { %p1365_p12 = pnand %p1364_p10, %p1358_p13 }
 0x269   : > { %1368 = shalt.err (!%p1365_p12)
}
 0x26a   : > { %1255 = dma.vmem_to_hbm [thread:$0]  (%p1720_p9), %s856_s12, 128, %s1663_s20, %s838_s22   ;;  %v828_v32 = vshrl.u32 %v246_v8, 7  ;;  %v826_v38 = vpop.xlane.xlu0 %825  ;;  %vm835_vm5 = vcmask 7168  }
 0x26b   : > { %s979_s11 = sshll.u32 %s1463_s19, 3  ;;  %s235_s25 = scalar_lea.vmem %s1709_s4, %s1529_s27 }
 0x26c   : > { %v830_v33 = vstv %s979_s11 }
 0x26d   : > { %v831_v35 = vadd.s32 %v830_v33, %v828_v32 }
 0x26f   : > { %vm832_vm4 = vcmp.lt.s32.totalorder %v831_v35, 16 }
 0x2ea   : > { %v815_v31 = vpop.xlane.xlu1 %814 }
 0x2eb   : > { %1311 = vlog2.f32 %v815_v31 }
 0x2f5   : > { %v1312_v34 = vpop.eup %1311 }
 0x2f6   : > { %v817_v36 = vmul.f32 0.6931472, %v1312_v34 }
 0x2f8   : > { %v818_v37 = vadd.f32 %v817_v36, %v810_v27 }
 0x2fa   : > { %v833_v39 = vsub.f32 %v818_v37, %v826_v38 }
 0x2fc   : > { %v834_v40 = vsel %vm832_vm4, %v833_v39, 0.0 }
 0x2fd   : > { %836 = vst.msk [vmem:[%s235_s25] sm:$0xff] %vm835_vm5, %v834_v40 }
 0x2fe PF: > { %p1267_p9 = scmp.ge.s32.totalorder %s1407_s18, 2  ;;  %s870_s19 = sand.u32 1, %s1395_s15  }
 0x2ff   : > { %p1721_p2 = scmp.ne.s32.totalorder %s1714_s26, 0  ;;  %s871_s12 = scalar_lea.sflag [#allocation4], %s870_s19 }
 0x301   : > { %p1262_p3 = pnand %p1267_p9, %p1721_p2 }
 0x303   : > { %1390 = dma.done.wait (!%p1262_p3), %s871_s12, 128  }
 0x304   : > { %1392 = vsyncadd (!%p1262_p3), %s871_s12, 4294967168  ;;  %p16_p4 = scmp.ge.s32.totalorder %s1467_s21, 4   ;;  %s1722_s15 = smov %s1399_s16 }
 0x305   : > { %s1723_s16 = smov %s1403_s17  ;;  %s1724_s17 = smov %s1478_s24 }
 0x306   : > { %s1725_s18 = smov %s1467_s21  ;;  %18 = sbr.rel (!%p16_p4) target bundleno = 4 (0x4), region = 87 }
 0x30d   :  { %883 = vsyncpa [#allocation3], 1 }
 0x30e   :  { %885 = vsyncpa [#allocation3 + $0x1], 1 }
 0x30f   :  { %886 = vsyncpa [#allocation4], 1 }
 0x310   :  { %888 = vsyncpa [#allocation4 + $0x1], 1 }

</bundles_post_ra>
